<compile_context>
chip_gen: v5e
topology: v5e:2x2
jax: 0.10.0
libtpu: 0.0.40
codegen_flags: <defaults>
</compile_context>

<pallas_src>
from functools import partial

import numpy as np
import jax
import jax.numpy as jnp
from jax.experimental import pallas as pl
from jax.experimental.pallas import tpu as pltpu

PAD = 128  # lane width; every feature dim (<=32 here) is padded to this


def _round_up(x, m):
    return ((x + m - 1) // m) * m


# ---------------------------------------------------------------------------
# Kernel: whole encoder -> ReLU -> decoder chain fused, one batch tile per grid step
# ---------------------------------------------------------------------------

def _ae_fused_kernel(x_ref, w_ref, b_ref, o_ref, *, relu_flags, in0_rows):
    """x_ref:  (tile_b, in0_rows) f32   lane-padded concat(states, actions)
       w_ref:  (L, 128, 128)      bf16  layer i weight in [:in_i, :out_i], zeros elsewhere
       b_ref:  (L, 128)           f32   layer i bias   in [:out_i],        zeros elsewhere
       o_ref:  (tile_b, 128)            lane-dense output (valid cols sliced in wrapper)
    """
    n_layers = len(relu_flags)
    b = b_ref[...]                                   # (L, 128) f32, tiny — load once

    # ---- layer 0: single aligned matmul (in0_rows is a multiple of 8) ----
    w0 = w_ref[0]                                    # (128, 128) bf16
    h = jnp.dot(x_ref[...].astype(jnp.bfloat16), w0[:in0_rows, :],
                preferred_element_type=jnp.float32)  # f32 accumulation
    h = h + b[0:1, :]
    if relu_flags[0]:
        h = jnp.maximum(h, 0.0)

    # ---- remaining layers: full 128x128 bf16 matmuls, f32 accumulate / bias / ReLU ----
    for i in range(1, n_layers):
        h = jnp.dot(h.astype(jnp.bfloat16), w_ref[i],
                    preferred_element_type=jnp.float32) + b[i:i + 1, :]
        if relu_flags[i]:
            h = jnp.maximum(h, 0.0)

    o_ref[...] = h.astype(o_ref.dtype)               # unmasked, 128-lane-dense store


# ---------------------------------------------------------------------------
# Wrapper
# ---------------------------------------------------------------------------

def _choose_tiling(B, max_tile_b):
    """Returns (tile_b, num_steps). Avoids padding when round_up(B,8) tiles evenly; uses an
    even step count for multi-step grids so v7x's two TensorCores get balanced work."""
    B8 = _round_up(B, 8)
    if B8 <= max_tile_b:
        return B8, 1
    num_steps = -(-B8 // max_tile_b)
    if num_steps % 2:                 # v7x megacore balance; harmless extra step on 1-TC chips
        num_steps += 1
    tile_b = _round_up(-(-B8 // num_steps), 8)
    return tile_b, num_steps


def autoencoder_forward_pallas(states, actions, w_slab, b_slab, relu_flags,
                               state_dim, action_dim, out_dim, *,
                               use_actions=True, max_tile_b=1024,
                               out_dtype=jnp.float32):
    B = states.shape[0]
    n_layers = w_slab.shape[0]
    assert len(relu_flags) == n_layers

    in0 = state_dim + action_dim if use_actions else state_dim
    in0_rows = _round_up(in0, 8)              # aligned contraction rows for layer 0

    tile_b, num_steps = _choose_tiling(B, max_tile_b)
    B_pad = tile_b * num_steps

    # Single fused input build: the concat the module does anyway, lane-padded to an
    # 8-multiple; batch tail padded only when unavoidable.
    parts = [states, actions] if use_actions else [states]
    x0 = jnp.concatenate(parts, axis=-1) if len(parts) > 1 else parts[0]
    pad_cols = in0_rows - in0
    pad_rows = B_pad - B
    if pad_cols or pad_rows:
        x0 = jnp.pad(x0, ((0, pad_rows), (0, pad_cols)))

    kernel = partial(_ae_fused_kernel, relu_flags=tuple(relu_flags), in0_rows=in0_rows)

    out_padded = pl.pallas_call(
        kernel,
        out_shape=jax.ShapeDtypeStruct((B_pad, PAD), out_dtype),
        grid_spec=pltpu.PrefetchScalarGridSpec(
            num_scalar_prefetch=0,
            grid=(num_steps,),
            in_specs=[
                pl.BlockSpec((tile_b, in0_rows), lambda i: (i, 0)),
                pl.BlockSpec(w_slab.shape, lambda i: (0, 0, 0)),   # resident, revisited
                pl.BlockSpec(b_slab.shape, lambda i: (0, 0)),      # resident, revisited
            ],
            out_specs=pl.BlockSpec((tile_b, PAD), lambda i: (i, 0)),
        ),
        compiler_params=pltpu.CompilerParams(
            dimension_semantics=("parallel",) if num_steps > 1 else ("arbitrary",),
        ),
    )(x0, w_slab, b_slab)

    # TODO(synk): downstream consumers can take the (B_pad, 128) slab directly (or bf16
    # out_dtype) to skip this extra HBM slice pass; kept here to match the module's contract.
    return out_padded[:B, :out_dim]


# ---------------------------------------------------------------------------
# Parameter construction (deterministic, mirrors AutoEncoder.__init__/init_weights)
# ---------------------------------------------------------------------------

def xavier_uniform(key, fan_in, fan_out):
    bound = (6.0 / (fan_in + fan_out)) ** 0.5
    return jax.random.uniform(key, (fan_in, fan_out), jnp.float32, -bound, bound)


def build_autoencoder_params(key, state_dim, action_dim, output_size,
                             hidden_units=(32, 16), latent_size=8, use_actions=True):
    input_size = state_dim + action_dim if use_actions else state_dim
    enc_dims = [input_size, *hidden_units, latent_size]          # encoder MLP
    dec_dims = [latent_size, *hidden_units[::-1], output_size]   # decoder MLP

    # Full chain: encoder hidden ReLUs, explicit F.relu on the encoder output,
    # decoder hidden ReLUs, no activation on the final layer.
    all_dims = enc_dims + dec_dims[1:]
    n_layers = len(all_dims) - 1
    relu_flags = [True] * (n_layers - 1) + [False]

    weights, biases = [], []
    keys = jax.random.split(key, n_layers)
    for i in range(n_layers):
        fan_in, fan_out = all_dims[i], all_dims[i + 1]
        weights.append(xavier_uniform(keys[i], fan_in, fan_out))
        biases.append(jnp.full((fan_out,), 0.01, jnp.float32))    # layer.bias.data.fill_(0.01)
    return weights, biases, relu_flags


def pack_params(weights, biases, pad=PAD):
    """Pack per-layer (in,out) weights / (out,) biases into lane-padded slabs.
    Weights are stored bf16 (MXU-native); biases stay f32 (VPU add in f32)."""
    n = len(weights)
    w_slab = np.zeros((n, pad, pad), np.float32)
    b_slab = np.zeros((n, pad), np.float32)
    for i, (w, b) in enumerate(zip(weights, biases)):
        fi, fo = w.shape
        assert fi <= pad and fo <= pad, "feature dims must fit in one 128-lane tile"
        w_slab[i, :fi, :fo] = np.asarray(w)
        b_slab[i, :fo] = np.asarray(b)
    return jnp.asarray(w_slab, dtype=jnp.bfloat16), jnp.asarray(b_slab, dtype=jnp.float32)


# ---------------------------------------------------------------------------
# Pure-JAX reference (same bf16-operand / f32-accumulate math as the kernel)
# ---------------------------------------------------------------------------

def _reference_forward(states, actions, weights, biases, relu_flags, use_actions=True):
    h = jnp.concatenate([states, actions], axis=-1) if use_actions else states
    for (w, b), do_relu in zip(zip(weights, biases), relu_flags):
        h = jnp.dot(h.astype(jnp.bfloat16), w.astype(jnp.bfloat16),
                    preferred_element_type=jnp.float32) + b[None, :]
        if do_relu:
            h = jnp.maximum(h, 0.0)
    return h


if __name__ == "__main__":
    key = jax.random.PRNGKey(0)
    k_params, k_data = jax.random.split(key)

    state_dim, action_dim = 12, 4
    output_size = 12
    hidden_units = (32, 16)
    latent_size = 8

    weights, biases, relu_flags = build_autoencoder_params(
        k_params, state_dim, action_dim, output_size,
        hidden_units=hidden_units, latent_size=latent_size, use_actions=True)
    w_slab, b_slab = pack_params(weights, biases)

    def run_and_check(B, max_tile_b=1024):
        ks, ka = jax.random.split(jax.random.fold_in(k_data, B))
        states = jax.random.normal(ks, (B, state_dim), jnp.float32)
        actions = jax.random.normal(ka, (B, action_dim), jnp.float32)
        out = autoencoder_forward_pallas(
            states, actions, w_slab, b_slab, relu_flags,
            state_dim, action_dim, output_size,
            use_actions=True, max_tile_b=max_tile_b)
        out = jax.block_until_ready(out)
        ref = _reference_forward(states, actions, weights, biases, relu_flags)
        assert out.shape == (B, output_size)
        assert jnp.allclose(out, ref, atol=1e-4, rtol=1e-4), f"mismatch vs reference (B={B})"

    run_and_check(16)                  # single grid step, no padding
    run_and_check(19)                  # single grid step, minimal batch-tail padding
    run_and_check(64, max_tile_b=16)   # multi-step "parallel" grid (even step count)

    print("KERNEL_OK")
</pallas_src>

<mosaic_0001>
module attributes {stable_mosaic.version = 11 : i64} {
  func.func @_ae_fused_kernel(%arg0: i32, %arg1: memref<16x16xf32, #tpu.memory_space<vmem>>, %arg2: memref<6x128x128xbf16, #tpu.memory_space<vmem>>, %arg3: memref<6x128xf32, #tpu.memory_space<vmem>>, %arg4: memref<16x128xf32, #tpu.memory_space<vmem>>) attributes {dimension_semantics = [#tpu.dimension_semantics<arbitrary>], iteration_bounds = array<i64: 1>, scalar_prefetch = 0 : i64, scratch_operands = 0 : i64, tpu.core_type = #tpu.core_type<tc>, window_params = [{transform_indices = @transform_0, window_bounds = array<i64: 16, 16>}, {pipeline_mode = #tpu.pipeline_mode<synchronous>, transform_indices = @transform_1, window_bounds = array<i64: 6, 128, 128>}, {pipeline_mode = #tpu.pipeline_mode<synchronous>, transform_indices = @transform_2, window_bounds = array<i64: 6, 128>}, {transform_indices = @transform_3, window_bounds = array<i64: 16, 128>}]} {
    %c0 = arith.constant 0 : index
    %c0_0 = arith.constant 0 : index
    %0 = vector.load %arg3[%c0, %c0_0] : memref<6x128xf32, #tpu.memory_space<vmem>>, vector<6x128xf32>
    %c0_1 = arith.constant 0 : index
    %c0_2 = arith.constant 0 : index
    %c0_3 = arith.constant 0 : index
    %1 = vector.load %arg2[%c0_1, %c0_2, %c0_3] : memref<6x128x128xbf16, #tpu.memory_space<vmem>>, vector<1x128x128xbf16>
    %2 = vector.shape_cast %1 : vector<1x128x128xbf16> to vector<128x128xbf16>
    %c0_4 = arith.constant 0 : index
    %c0_5 = arith.constant 0 : index
    %3 = vector.load %arg1[%c0_4, %c0_5] : memref<16x16xf32, #tpu.memory_space<vmem>>, vector<16x16xf32>
    %4 = arith.truncf %3 : vector<16x16xf32> to vector<16x16xbf16>
    %5 = vector.extract_strided_slice %2 {offsets = [0, 0], sizes = [16, 128], strides = [1, 1]} : vector<128x128xbf16> to vector<16x128xbf16>
    %cst = arith.constant dense<0.000000e+00> : vector<16x128xf32>
    %6 = tpu.matmul %4, %5, %cst {dimension_numbers = #tpu.dot_dimension_numbers<[1], [0], [0], [1], [0, 0, 1, 1], [], []>} : vector<16x16xbf16>, vector<16x128xbf16>, vector<16x128xf32> -> vector<16x128xf32>
    %7 = vector.extract_strided_slice %0 {offsets = [0, 0], sizes = [1, 128], strides = [1, 1]} : vector<6x128xf32> to vector<1x128xf32>
    %8 = vector.broadcast %7 : vector<1x128xf32> to vector<16x128xf32>
    %9 = arith.addf %6, %8 : vector<16x128xf32>
    %cst_6 = arith.constant 0.000000e+00 : f32
    %10 = vector.broadcast %cst_6 : f32 to vector<16x128xf32>
    %11 = arith.maximumf %9, %10 : vector<16x128xf32>
    %12 = arith.truncf %11 : vector<16x128xf32> to vector<16x128xbf16>
    %c1 = arith.constant 1 : index
    %c0_7 = arith.constant 0 : index
    %c0_8 = arith.constant 0 : index
    %13 = vector.load %arg2[%c1, %c0_7, %c0_8] : memref<6x128x128xbf16, #tpu.memory_space<vmem>>, vector<1x128x128xbf16>
    %14 = vector.shape_cast %13 : vector<1x128x128xbf16> to vector<128x128xbf16>
    %cst_9 = arith.constant dense<0.000000e+00> : vector<16x128xf32>
    %15 = tpu.matmul %12, %14, %cst_9 {dimension_numbers = #tpu.dot_dimension_numbers<[1], [0], [0], [1], [0, 0, 1, 1], [], []>} : vector<16x128xbf16>, vector<128x128xbf16>, vector<16x128xf32> -> vector<16x128xf32>
    %16 = vector.extract_strided_slice %0 {offsets = [1, 0], sizes = [1, 128], strides = [1, 1]} : vector<6x128xf32> to vector<1x128xf32>
    %17 = vector.broadcast %16 : vector<1x128xf32> to vector<16x128xf32>
    %18 = arith.addf %15, %17 : vector<16x128xf32>
    %cst_10 = arith.constant 0.000000e+00 : f32
    %19 = vector.broadcast %cst_10 : f32 to vector<16x128xf32>
    %20 = arith.maximumf %18, %19 : vector<16x128xf32>
    %21 = arith.truncf %20 : vector<16x128xf32> to vector<16x128xbf16>
    %c2 = arith.constant 2 : index
    %c0_11 = arith.constant 0 : index
    %c0_12 = arith.constant 0 : index
    %22 = vector.load %arg2[%c2, %c0_11, %c0_12] : memref<6x128x128xbf16, #tpu.memory_space<vmem>>, vector<1x128x128xbf16>
    %23 = vector.shape_cast %22 : vector<1x128x128xbf16> to vector<128x128xbf16>
    %cst_13 = arith.constant dense<0.000000e+00> : vector<16x128xf32>
    %24 = tpu.matmul %21, %23, %cst_13 {dimension_numbers = #tpu.dot_dimension_numbers<[1], [0], [0], [1], [0, 0, 1, 1], [], []>} : vector<16x128xbf16>, vector<128x128xbf16>, vector<16x128xf32> -> vector<16x128xf32>
    %25 = vector.extract_strided_slice %0 {offsets = [2, 0], sizes = [1, 128], strides = [1, 1]} : vector<6x128xf32> to vector<1x128xf32>
    %26 = vector.broadcast %25 : vector<1x128xf32> to vector<16x128xf32>
    %27 = arith.addf %24, %26 : vector<16x128xf32>
    %cst_14 = arith.constant 0.000000e+00 : f32
    %28 = vector.broadcast %cst_14 : f32 to vector<16x128xf32>
    %29 = arith.maximumf %27, %28 : vector<16x128xf32>
    %30 = arith.truncf %29 : vector<16x128xf32> to vector<16x128xbf16>
    %c3 = arith.constant 3 : index
    %c0_15 = arith.constant 0 : index
    %c0_16 = arith.constant 0 : index
    %31 = vector.load %arg2[%c3, %c0_15, %c0_16] : memref<6x128x128xbf16, #tpu.memory_space<vmem>>, vector<1x128x128xbf16>
    %32 = vector.shape_cast %31 : vector<1x128x128xbf16> to vector<128x128xbf16>
    %cst_17 = arith.constant dense<0.000000e+00> : vector<16x128xf32>
    %33 = tpu.matmul %30, %32, %cst_17 {dimension_numbers = #tpu.dot_dimension_numbers<[1], [0], [0], [1], [0, 0, 1, 1], [], []>} : vector<16x128xbf16>, vector<128x128xbf16>, vector<16x128xf32> -> vector<16x128xf32>
    %34 = vector.extract_strided_slice %0 {offsets = [3, 0], sizes = [1, 128], strides = [1, 1]} : vector<6x128xf32> to vector<1x128xf32>
    %35 = vector.broadcast %34 : vector<1x128xf32> to vector<16x128xf32>
    %36 = arith.addf %33, %35 : vector<16x128xf32>
    %cst_18 = arith.constant 0.000000e+00 : f32
    %37 = vector.broadcast %cst_18 : f32 to vector<16x128xf32>
    %38 = arith.maximumf %36, %37 : vector<16x128xf32>
    %39 = arith.truncf %38 : vector<16x128xf32> to vector<16x128xbf16>
    %c4 = arith.constant 4 : index
    %c0_19 = arith.constant 0 : index
    %c0_20 = arith.constant 0 : index
    %40 = vector.load %arg2[%c4, %c0_19, %c0_20] : memref<6x128x128xbf16, #tpu.memory_space<vmem>>, vector<1x128x128xbf16>
    %41 = vector.shape_cast %40 : vector<1x128x128xbf16> to vector<128x128xbf16>
    %cst_21 = arith.constant dense<0.000000e+00> : vector<16x128xf32>
    %42 = tpu.matmul %39, %41, %cst_21 {dimension_numbers = #tpu.dot_dimension_numbers<[1], [0], [0], [1], [0, 0, 1, 1], [], []>} : vector<16x128xbf16>, vector<128x128xbf16>, vector<16x128xf32> -> vector<16x128xf32>
    %43 = vector.extract_strided_slice %0 {offsets = [4, 0], sizes = [1, 128], strides = [1, 1]} : vector<6x128xf32> to vector<1x128xf32>
    %44 = vector.broadcast %43 : vector<1x128xf32> to vector<16x128xf32>
    %45 = arith.addf %42, %44 : vector<16x128xf32>
    %cst_22 = arith.constant 0.000000e+00 : f32
    %46 = vector.broadcast %cst_22 : f32 to vector<16x128xf32>
    %47 = arith.maximumf %45, %46 : vector<16x128xf32>
    %48 = arith.truncf %47 : vector<16x128xf32> to vector<16x128xbf16>
    %c5 = arith.constant 5 : index
    %c0_23 = arith.constant 0 : index
    %c0_24 = arith.constant 0 : index
    %49 = vector.load %arg2[%c5, %c0_23, %c0_24] : memref<6x128x128xbf16, #tpu.memory_space<vmem>>, vector<1x128x128xbf16>
    %50 = vector.shape_cast %49 : vector<1x128x128xbf16> to vector<128x128xbf16>
    %cst_25 = arith.constant dense<0.000000e+00> : vector<16x128xf32>
    %51 = tpu.matmul %48, %50, %cst_25 {dimension_numbers = #tpu.dot_dimension_numbers<[1], [0], [0], [1], [0, 0, 1, 1], [], []>} : vector<16x128xbf16>, vector<128x128xbf16>, vector<16x128xf32> -> vector<16x128xf32>
    %52 = vector.extract_strided_slice %0 {offsets = [5, 0], sizes = [1, 128], strides = [1, 1]} : vector<6x128xf32> to vector<1x128xf32>
    %53 = vector.broadcast %52 : vector<1x128xf32> to vector<16x128xf32>
    %54 = arith.addf %51, %53 : vector<16x128xf32>
    %c0_26 = arith.constant 0 : index
    %c0_27 = arith.constant 0 : index
    %55 = vector.load %arg4[%c0_26, %c0_27] : memref<16x128xf32, #tpu.memory_space<vmem>>, vector<16x128xf32>
    tpu.vector_store %arg4[%c0_26, %c0_27], %54 {strides = array<i32>} : memref<16x128xf32, #tpu.memory_space<vmem>>, vector<16x128xf32>,
    return
  }
  func.func @transform_0(%arg0: i32) -> (i32, i32) {
    %c0_i32 = arith.constant 0 : i32
    %c0_i32_0 = arith.constant 0 : i32
    return %arg0, %c0_i32 : i32, i32
  }
  func.func @transform_1(%arg0: i32) -> (i32, i32, i32) {
    %c0_i32 = arith.constant 0 : i32
    %c0_i32_0 = arith.constant 0 : i32
    %c0_i32_1 = arith.constant 0 : i32
    %c0_i32_2 = arith.constant 0 : i32
    return %c0_i32, %c0_i32_0, %c0_i32_1 : i32, i32, i32
  }
  func.func @transform_2(%arg0: i32) -> (i32, i32) {
    %c0_i32 = arith.constant 0 : i32
    %c0_i32_0 = arith.constant 0 : i32
    %c0_i32_1 = arith.constant 0 : i32
    return %c0_i32, %c0_i32_0 : i32, i32
  }
  func.func @transform_3(%arg0: i32) -> (i32, i32) {
    %c0_i32 = arith.constant 0 : i32
    %c0_i32_0 = arith.constant 0 : i32
    return %arg0, %c0_i32 : i32, i32
  }
}

</mosaic_0001>

<bundles_post_ra>
// kernel: tpu_custom_call.1
= control target key start
LH: loop header
LB: loop body
LE: loop exit
PB: predicated region body
PF: predicated region fallthrough
CT: control target
= control target key end

     0   :  { %8 = vsyncpa [#allocation3], 0  ;;  %s899_s0 = inlined_call_operand.hbm [shape: f32[16,16], index: 0, kind: input, shape index: {}]   ;;  %s900_s1 = inlined_call_operand.hbm [shape: bf16[6,128,128], index: 1, kind: input, shape index: {}]   ;;  %s901_s2 = inlined_call_operand.hbm [shape: f32[6,128], index: 2, kind: input, shape index: {}]   ;;  %s902_s3 = inlined_call_operand.hbm [shape: f32[16,128], index: 3, kind: output, shape index: {}]  }
   0x1   :  { %9 = vsyncpa [#allocation6], 0  ;;  %s28_s14 = sshll.u32 %s900_s1, 4  ;;  %s29_s14 = int_to_ptr.hbm [resolvable:$true] %s28_s14 }
   0x2   :  { %10 = vsyncpa [#allocation4], 0  ;;  %s845_s15 = smov [#allocation5]   ;;  %s15_s19 = sshll.u32 %s899_s0, 4  ;;  %s16_s19 = int_to_ptr.hbm [resolvable:$true] %s15_s19 }
   0x3   :  { %s30_s16 = sshll.u32 %s845_s15, 4  ;;  %s846_s20 = smov 64   ;;  %s31_s16 = int_to_ptr.vmem [resolvable:$true] %s30_s16 }
   0x4   :  { %s847_s21 = smov 4   ;;  %s848_s22 = smov [#allocation2]  }
   0x5   :  { %36 = dma.hbm_to_vmem [thread:$0]  %s29_s14, 6144, %s31_s16, [#allocation6], %s846_s20, %s846_s20, %s847_s21  }
   0x6   :  { %s17_s23 = sshll.u32 %s848_s22, 4  ;;  %s849_s24 = smov 128   ;;  %s18_s23 = int_to_ptr.vmem [resolvable:$true] %s17_s23 }
   0x7   :  { %s850_s25 = smov 8   ;;  %s42_s27 = sshll.u32 %s901_s2, 4  ;;  %s43_s27 = int_to_ptr.hbm [resolvable:$true] %s42_s27 }
   0x8   :  { %23 = dma.hbm_to_vmem [thread:$0]  %s16_s19, 256, %s18_s23, [#allocation3], %s849_s24, %s849_s24, %s850_s25  }
   0x9   :  { %s851_s28 = smov [#allocation7]  }
   0xa   :  { %s44_s0 = sshll.u32 %s851_s28, 4  ;;  %s45_s0 = int_to_ptr.vmem [resolvable:$true] %s44_s0 }
   0xb   :  { %47 = dma.hbm_to_vmem [thread:$0]  %s43_s27, 128, %s45_s0, [#allocation6]  }
   0xc   :  { %839 = dma.done.wait [#allocation3], 256  }
   0xd   :  { %840 = vsyncadd [#allocation3], 4294967040 }
   0xe   :  { %841 = dma.done.wait [#allocation6], 6272  }
   0xf   :  { %842 = vsyncadd [#allocation6], 4294961024  ;;  %v694_v0 = vld [vmem:[#allocation5] sm:$0xff]  ;;  %v64_v1 = vld [vmem:[#allocation2] sm:$0xff]  ;;  %vm74_vm0 = vcmask 130048   ;;  %s852_s2 = smov [#allocation8]  }
  0x10   :  { %v65_v2 = vld [vmem:[#allocation2 + $0x8] sm:$0xff]  ;;  %85 = vmatpush.bf16.msra.mxu0 %v694_v0  ;;  %v701_v5 = vld [vmem:[#allocation5 + $0x70] sm:$0xff]  ;;  %v700_v6 = vld [vmem:[#allocation5 + $0x68] sm:$0xff]  ;;  %s513_s29 = sshll.u32 %s852_s2, 4  ;;  %s515_s5 = sshll.u32 %s902_s3, 4  ;;  %s514_s29 = int_to_ptr.vmem [resolvable:$true] %s513_s29  ;;  %s516_s5 = int_to_ptr.hbm [resolvable:$true] %s515_s5 }
  0x11   :  { %v66_v3 = vpack.c.bf16 %v65_v2, %v64_v1  ;;  %v702_v4 = vld [vmem:[#allocation5 + $0x78] sm:$0xff]  ;;  %v699_v7 = vld [vmem:[#allocation5 + $0x60] sm:$0xff]  ;;  %v697_v9 = vld [vmem:[#allocation5 + $0x50] sm:$0xff] }
  0x12   :  { %161 = vmatpush.bf16.msra.mxu1 %v702_v4  ;;  %v698_v8 = vld [vmem:[#allocation5 + $0x58] sm:$0xff]  ;;  %v696_v10 = vld [vmem:[#allocation5 + $0x48] sm:$0xff]  ;;  %v695_v11 = vld [vmem:[#allocation5 + $0x40] sm:$0xff] }
  0x13   :  { %533 = vmatmul.msk.bf16.vlgmr.msra.gmra.mxu0 %vm74_vm0, %v66_v3  ;;  %v710_v12 = vld [vmem:[#allocation5 + $0xb8] sm:$0xff]  ;;  %v709_v13 = vld [vmem:[#allocation5 + $0xb0] sm:$0xff]  ;;  %v708_v14 = vld [vmem:[#allocation5 + $0xa8] sm:$0xff] }
  0x14   :  { %244 = vmatpush.bf16.msra.mxu2 %v710_v12  ;;  %v707_v15 = vld [vmem:[#allocation5 + $0xa0] sm:$0xff]  ;;  %v706_v25 = vld [vmem:[#allocation5 + $0x98] sm:$0xff]  ;;  %v705_v26 = vld [vmem:[#allocation5 + $0x90] sm:$0xff] }
  0x15   :  { %v885_v16 = vld [vmem:[#allocation7] sm:$0x3f]  ;;  %v704_v27 = vld [vmem:[#allocation5 + $0x88] sm:$0xff]  ;;  %v718_v29 = vld [vmem:[#allocation5 + $0xf8] sm:$0xff] }
  0x16   :  { %162 = vmatpush.bf16.msra.mxu1 %v701_v5  ;;  %v67_v18 = vperm.slane %v885_v16, 0  ;;  %v703_v28 = vld [vmem:[#allocation5 + $0x80] sm:$0xff]  ;;  %327 = vmatpush.bf16.msra.mxu3 %v718_v29  ;;  %v717_v30 = vld [vmem:[#allocation5 + $0xf0] sm:$0xff]  ;;  %v716_v31 = vld [vmem:[#allocation5 + $0xe8] sm:$0xff]  ;;  %v112_v34 = vperm.slane %v885_v16, 1  ;;  %v195_v50 = vperm.slane %v885_v16, 2 }
  0x17   :  { %v715_v32 = vld [vmem:[#allocation5 + $0xe0] sm:$0xff]  ;;  %v714_v41 = vld [vmem:[#allocation5 + $0xd8] sm:$0xff]  ;;  %v713_v42 = vld [vmem:[#allocation5 + $0xd0] sm:$0xff]  ;;  %v278_v2 = vperm.slane %v885_v16, 3 }
  0x18   :  { %245 = vmatpush.bf16.msra.mxu2 %v709_v13  ;;  %v712_v43 = vld [vmem:[#allocation5 + $0xc8] sm:$0xff]  ;;  %v711_v44 = vld [vmem:[#allocation5 + $0xc0] sm:$0xff]  ;;  %v726_v45 = vld [vmem:[#allocation5 + $0x138] sm:$0xff] }
  0x19   :  { %410 = vmatpush.bf16.msrb.mxu0 %v726_v45  ;;  %v725_v46 = vld [vmem:[#allocation5 + $0x130] sm:$0xff]  ;;  %v724_v47 = vld [vmem:[#allocation5 + $0x128] sm:$0xff]  ;;  %v723_v48 = vld [vmem:[#allocation5 + $0x120] sm:$0xff] }
  0x1a   :  { %163 = vmatpush.bf16.msra.mxu1 %v700_v6  ;;  %328 = vmatpush.bf16.msra.mxu3 %v717_v30  ;;  %v722_v57 = vld [vmem:[#allocation5 + $0x118] sm:$0xff]  ;;  %v721_v58 = vld [vmem:[#allocation5 + $0x110] sm:$0xff]  ;;  %v720_v59 = vld [vmem:[#allocation5 + $0x108] sm:$0xff] }
  0x1b   :  { %v719_v60 = vld [vmem:[#allocation5 + $0x100] sm:$0xff]  ;;  %v734_v61 = vld [vmem:[#allocation5 + $0x178] sm:$0xff]  ;;  %v733_v62 = vld [vmem:[#allocation5 + $0x170] sm:$0xff] }
  0x1c   :  { %246 = vmatpush.bf16.msra.mxu2 %v708_v14  ;;  %v732_v63 = vld [vmem:[#allocation5 + $0x168] sm:$0xff]  ;;  %v731_v0 = vld [vmem:[#allocation5 + $0x160] sm:$0xff]  ;;  %v361_v14 = vperm.slane %v885_v16, 4 }
  0x1d   :  { %411 = vmatpush.bf16.msrb.mxu0 %v725_v46  ;;  %v727_v12 = vld [vmem:[#allocation5 + $0x140] sm:$0xff] }
  0x1e   :  { %164 = vmatpush.bf16.msra.mxu1 %v699_v7  ;;  %329 = vmatpush.bf16.msra.mxu3 %v716_v31 }
  0x20   :  { %247 = vmatpush.bf16.msra.mxu2 %v707_v15 }
  0x21   :  { %412 = vmatpush.bf16.msrb.mxu0 %v724_v47 }
  0x22   :  { %165 = vmatpush.bf16.msra.mxu1 %v698_v8  ;;  %330 = vmatpush.bf16.msra.mxu3 %v715_v32 }
  0x24   :  { %248 = vmatpush.bf16.msra.mxu2 %v706_v25 }
  0x25   :  { %413 = vmatpush.bf16.msrb.mxu0 %v723_v48 }
  0x26   :  { %166 = vmatpush.bf16.msra.mxu1 %v697_v9  ;;  %331 = vmatpush.bf16.msra.mxu3 %v714_v41  ;;  %v730_v9 = vld [vmem:[#allocation5 + $0x158] sm:$0xff] }
  0x28   :  { %249 = vmatpush.bf16.msra.mxu2 %v705_v26 }
  0x29   :  { %414 = vmatpush.bf16.msrb.mxu0 %v722_v57 }
  0x2a   :  { %167 = vmatpush.bf16.msra.mxu1 %v696_v10  ;;  %332 = vmatpush.bf16.msra.mxu3 %v713_v42  ;;  %v729_v10 = vld [vmem:[#allocation5 + $0x150] sm:$0xff] }
  0x2c   :  { %250 = vmatpush.bf16.msra.mxu2 %v704_v27 }
  0x2d   :  { %415 = vmatpush.bf16.msrb.mxu0 %v721_v58 }
  0x2e   :  { %168 = vmatpush.bf16.msra.mxu1 %v695_v11  ;;  %333 = vmatpush.bf16.msra.mxu3 %v712_v43  ;;  %v728_v11 = vld [vmem:[#allocation5 + $0x148] sm:$0xff] }
  0x30   :  { %251 = vmatpush.bf16.msra.mxu2 %v703_v28 }
  0x31   :  { %416 = vmatpush.bf16.msrb.mxu0 %v720_v59 }
  0x32   :  { %334 = vmatpush.bf16.msra.mxu3 %v711_v44  ;;  %493 = vmatpush.bf16.msrb.mxu1 %v734_v61 }
  0x35   :  { %417 = vmatpush.bf16.msrb.mxu0 %v719_v60 }
  0x36   :  { %494 = vmatpush.bf16.msrb.mxu1 %v733_v62 }
  0x3a   :  { %495 = vmatpush.bf16.msrb.mxu1 %v732_v63 }
  0x3e   :  { %496 = vmatpush.bf16.msrb.mxu1 %v731_v0 }
  0x42   :  { %497 = vmatpush.bf16.msrb.mxu1 %v730_v9 }
  0x46   :  { %498 = vmatpush.bf16.msrb.mxu1 %v729_v10 }
  0x4a   :  { %499 = vmatpush.bf16.msrb.mxu1 %v728_v11 }
  0x4e   :  { %500 = vmatpush.bf16.msrb.mxu1 %v727_v12 }
  0x90   :  { %v87_v17 = vpop.f32.mrf.mxu0 }
  0x91   :  { %v88_v19 = vadd.f32 %v87_v17, %v67_v18 }
  0x93   :  { %v92_v22 = vmax.f32 %v88_v19, 0.0 }
  0x98   :  { %v89_v20 = vpop.f32.mrf.mxu0 }
  0x99   :  { %v90_v21 = vadd.f32 %v89_v20, %v67_v18 }
  0x9b   :  { %v93_v23 = vmax.f32 %v90_v21, 0.0 }
  0x9d   :  { %v94_v24 = vpack.c.bf16 %v93_v23, %v92_v22  ;;  %v444_v22 = vperm.slane %v885_v16, 5 }
  0x9f   :  { %169 = vmatmul.bf16.vlgmr.msra.gmra.mxu1 %v94_v24 }
 0x11c   :  { %v170_v33 = vpop.f32.mrf.mxu1 }
 0x11d   :  { %v171_v35 = vadd.f32 %v170_v33, %v112_v34 }
 0x11f   :  { %v175_v38 = vmax.f32 %v171_v35, 0.0 }
 0x124   :  { %v172_v36 = vpop.f32.mrf.mxu1 }
 0x125   :  { %v173_v37 = vadd.f32 %v172_v36, %v112_v34 }
 0x127   :  { %v176_v39 = vmax.f32 %v173_v37, 0.0 }
 0x129   :  { %v177_v40 = vpack.c.bf16 %v176_v39, %v175_v38 }
 0x12b   :  { %252 = vmatmul.bf16.vlgmr.msra.gmra.mxu2 %v177_v40 }
 0x1ae   :  { %v253_v49 = vpop.f32.mrf.mxu2 }
 0x1af   :  { %v254_v51 = vadd.f32 %v253_v49, %v195_v50 }
 0x1b1   :  { %v258_v54 = vmax.f32 %v254_v51, 0.0 }
 0x1b6   :  { %v255_v52 = vpop.f32.mrf.mxu2 }
 0x1b7   :  { %v256_v53 = vadd.f32 %v255_v52, %v195_v50 }
 0x1b9   :  { %v259_v55 = vmax.f32 %v256_v53, 0.0 }
 0x1bb   :  { %v260_v56 = vpack.c.bf16 %v259_v55, %v258_v54 }
 0x1bd   :  { %335 = vmatmul.bf16.vlgmr.msra.gmra.mxu3 %v260_v56 }
 0x240   :  { %v336_v1 = vpop.f32.mrf.mxu3 }
 0x241   :  { %v337_v3 = vadd.f32 %v336_v1, %v278_v2 }
 0x243   :  { %v341_v6 = vmax.f32 %v337_v3, 0.0 }
 0x248   :  { %v338_v4 = vpop.f32.mrf.mxu3 }
 0x249   :  { %v339_v5 = vadd.f32 %v338_v4, %v278_v2 }
 0x24b   :  { %v342_v7 = vmax.f32 %v339_v5, 0.0 }
 0x24d   :  { %v343_v8 = vpack.c.bf16 %v342_v7, %v341_v6 }
 0x24f   :  { %418 = vmatmul.bf16.vlgmr.msrb.gmra.mxu0 %v343_v8 }
 0x2cc   :  { %v419_v13 = vpop.f32.mrf.mxu0 }
 0x2cd   :  { %v420_v15 = vadd.f32 %v419_v13, %v361_v14 }
 0x2cf   :  { %v424_v19 = vmax.f32 %v420_v15, 0.0 }
 0x2d4   :  { %v421_v17 = vpop.f32.mrf.mxu0 }
 0x2d5   :  { %v422_v18 = vadd.f32 %v421_v17, %v361_v14 }
 0x2d7   :  { %v425_v20 = vmax.f32 %v422_v18, 0.0 }
 0x2d9   :  { %v426_v21 = vpack.c.bf16 %v425_v20, %v424_v19 }
 0x2db   :  { %501 = vmatmul.bf16.vlgmr.msrb.gmra.mxu1 %v426_v21 }
 0x358   :  { %v502_v23 = vpop.f32.mrf.mxu1 }
 0x359   :  { %v503_v24 = vadd.f32 %v502_v23, %v444_v22 }
 0x35b   :  { %507 = vst [vmem:[#allocation8] sm:$0xff] %v503_v24 }
 0x360   :  { %v504_v25 = vpop.f32.mrf.mxu1 }
 0x361   :  { %v505_v26 = vadd.f32 %v504_v25, %v444_v22 }
 0x363   :  { %508 = vst [vmem:[#allocation8 + $0x8] sm:$0xff] %v505_v26 }
 0x364   :  { %521 = dma.vmem_to_hbm [thread:$0]  %s514_s29, 256, %s516_s5, [#allocation4], %s849_s24, %s849_s24, %s850_s25  }
 0x365   :  { %843 = dma.done.wait [#allocation4], 256  }
 0x366   :  { %844 = vsyncadd [#allocation4], 4294967040 }
 0x367   :  { %526 = vsyncpa [#allocation3], 1 }
 0x368   :  { %527 = vsyncpa [#allocation6], 1 }
 0x369   :  { %528 = vsyncpa [#allocation4], 1 }

</bundles_post_ra>
